<compile_context>
chip_gen: v7x
topology: tpu7x:2x2x1
jax: 0.10.0
libtpu: 0.0.40
codegen_flags: <defaults>
</compile_context>

<pallas_src>
import jax
import jax.numpy as jnp
from jax.experimental import pallas as pl
from jax.experimental.pallas import tpu as pltpu


# --------------------------------------------------------------------------------------
# Kernel
# --------------------------------------------------------------------------------------
def _pos_embed_kernel(x_ref, w1_ref, b1_ref, wdw_ref, w3_ref, b3_ref, o_ref):
    # x_ref  : (T, S, Cp)   matmul dtype (bf16/f32); BN already folded into w1/b1
    # w1_ref : (Cp, Cmp)    matmul dtype
    # b1_ref : (1, Cmp)     f32   (conv1 bias + folded BN shift)
    # wdw_ref: (3, Cmp)     f32   depthwise temporal taps
    # w3_ref : (Cmp, Cp)    matmul dtype
    # b3_ref : (1, Cp)      f32   (conv3 bias + folded depthwise bias)
    # o_ref  : (T, S, Cp)   f32
    T, S, _ = x_ref.shape
    Cm = w1_ref.shape[1]

    # ---- 1x1x1 conv (+ folded BN affine): per-point channel matmul on the MXU ----
    x2 = x_ref[...].reshape(T * S, x_ref.shape[2])
    mid = jnp.dot(x2, w1_ref[...], preferred_element_type=jnp.float32)
    mid = mid + b1_ref[...]                                   # (T*S, Cm) f32

    # ---- depthwise temporal conv, kernel (3,1,1), zero padding (1,0,0) ----
    # A +-1 frame shift is a +-S row shift in the (T*S, Cm) layout. No scratch, no halo.
    wdw = wdw_ref[...]                                        # (3, Cm) f32
    zero = jnp.zeros((S, Cm), jnp.float32)
    if T > 1:
        prev = jnp.concatenate([zero, mid[: (T - 1) * S, :]], axis=0)   # frame t-1
        nxt = jnp.concatenate([mid[S:, :], zero], axis=0)               # frame t+1
    else:
        prev = zero
        nxt = zero
    dw = prev * wdw[0:1, :] + mid * wdw[1:2, :] + nxt * wdw[2:3, :]     # f32 VPU work

    # ---- 1x1x1 conv back to d_model (+ folded biases) on the MXU ----
    out = jnp.dot(dw.astype(w3_ref.dtype), w3_ref[...],
                  preferred_element_type=jnp.float32)
    out = out + b3_ref[...]
    o_ref[...] = out.reshape(o_ref.shape).astype(o_ref.dtype)


# --------------------------------------------------------------------------------------
# Wrapper
# --------------------------------------------------------------------------------------
def _round_up(x, m):
    return ((x + m - 1) // m) * m


def _choose_tile_hw(HW, T, c_pad, cm_pad, in_bytes, budget_bytes=16 * 1024 * 1024):
    """Largest spatial tile whose double-buffered in/out DMA tiles + f32 temporaries
    fit a conservative VMEM budget (sized for v7x's 64 MiB VMEM / 32 MiB scoped limit)."""
    def cost(s):
        io = 2 * T * s * c_pad * (in_bytes + 4)     # double-buffered input + f32 output tiles
        tmp = 4 * T * s * cm_pad * 4                # mid / prev / nxt / dw f32 temporaries
        return io + tmp

    if cost(HW) <= budget_bytes:
        return HW                                   # whole spatial extent in one block
    s = max(8, (HW // 8) * 8)
    while s > 8 and cost(s) > budget_bytes:
        s -= 8
    return s


def my_temp_module_forward(x_ncthw, params, *, eps=1e-5, matmul_dtype=jnp.bfloat16):
    """Pallas forward. x_ncthw: (N, C, T, H, W) float32. Returns same shape, float32."""
    N, C, T, H, W = x_ncthw.shape
    HW = H * W
    Cm = params["conv1_w"].shape[0]

    # Lane-dense channel dims (multiples of 128). No-op when C/Cm are already dense.
    c_pad = _round_up(C, 128)
    cm_pad = _round_up(Cm, 128)

    # ---- fold BN (eval mode) into conv1, and the depthwise bias into conv3 ----
    bn_scale = params["bn_gamma"] / jnp.sqrt(params["bn_var"] + eps)      # (C,)
    bn_bias = params["bn_beta"] - params["bn_mean"] * bn_scale            # (C,)

    w1 = params["conv1_w"].reshape(Cm, C).T                               # (C, Cm)
    w1f = w1 * bn_scale[:, None]                                          # BN scale folded
    b1f = params["conv1_b"] + bn_bias @ w1                                # (Cm,)

    wdw = params["convdw_w"].reshape(Cm, 3).T                             # (3, Cm)
    w3 = params["conv3_w"].reshape(C, Cm).T                               # (Cm, C)
    b3f = params["conv3_b"] + params["convdw_b"] @ w3                     # (C,)

    # ---- pad channels to lane-dense widths; cast matmul operands ----
    w1p = jnp.pad(w1f, ((0, c_pad - C), (0, cm_pad - Cm))).astype(matmul_dtype)
    b1p = jnp.pad(b1f, (0, cm_pad - Cm)).astype(jnp.float32)[None, :]
    wdwp = jnp.pad(wdw, ((0, 0), (0, cm_pad - Cm))).astype(jnp.float32)
    w3p = jnp.pad(w3, ((0, cm_pad - Cm), (0, c_pad - C))).astype(matmul_dtype)
    b3p = jnp.pad(b3f, (0, c_pad - C)).astype(jnp.float32)[None, :]

    # ---- activations: NCTHW -> (N, T, HW, Cp), matmul dtype ----
    # NOTE: these transposes are layout glue; if the surrounding model can keep
    # activations channels-last they should be dropped (full HBM round trip each).
    x = jnp.transpose(x_ncthw, (0, 2, 3, 4, 1)).reshape(N, T, HW, C)
    if c_pad != C:
        x = jnp.pad(x, ((0, 0), (0, 0), (0, 0), (0, c_pad - C)))
    x = x.astype(matmul_dtype)

    in_bytes = jnp.dtype(matmul_dtype).itemsize
    tile_hw = _choose_tile_hw(HW, T, c_pad, cm_pad, in_bytes)
    n_hw = pl.cdiv(HW, tile_hw)

    out_flat = pl.pallas_call(
        _pos_embed_kernel,
        out_shape=jax.ShapeDtypeStruct((N, T, HW, c_pad), jnp.float32),
        grid_spec=pltpu.PrefetchScalarGridSpec(
            num_scalar_prefetch=0,
            grid=(N, n_hw),
            in_specs=[
                # activation tile (double-buffered by default)
                pl.BlockSpec((None, T, tile_hw, c_pad), lambda n, s: (n, 0, s, 0)),
                pl.BlockSpec((c_pad, cm_pad), lambda n, s: (0, 0)),   # w1 (BN folded)
                pl.BlockSpec((1, cm_pad), lambda n, s: (0, 0)),       # b1 (BN folded)
                pl.BlockSpec((3, cm_pad), lambda n, s: (0, 0)),       # depthwise taps
                pl.BlockSpec((cm_pad, c_pad), lambda n, s: (0, 0)),   # w3
                pl.BlockSpec((1, c_pad), lambda n, s: (0, 0)),        # b3 (+ folded bdw)
            ],
            out_specs=pl.BlockSpec((None, T, tile_hw, c_pad), lambda n, s: (n, 0, s, 0)),
        ),
        compiler_params=pltpu.CompilerParams(
            dimension_semantics=("parallel", "parallel"),
            vmem_limit_bytes=32 * 1024 * 1024,
        ),
    )(x, w1p, b1p, wdwp, w3p, b3p)

    out = out_flat[..., :C].reshape(N, T, H, W, C).transpose(0, 4, 1, 2, 3)
    return out


# --------------------------------------------------------------------------------------
# Pure-JAX reference (PyTorch NCTHW semantics, eval-mode BN, f32)
# --------------------------------------------------------------------------------------
def reference_forward(x, params, *, eps=1e-5):
    N, C, T, H, W = x.shape
    Cm = params["conv1_w"].shape[0]
    bn_scale = params["bn_gamma"] / jnp.sqrt(params["bn_var"] + eps)
    bn_bias = params["bn_beta"] - params["bn_mean"] * bn_scale
    xn = x * bn_scale[None, :, None, None, None] + bn_bias[None, :, None, None, None]

    w1 = params["conv1_w"].reshape(Cm, C)
    mid = (jnp.einsum("ncthw,mc->nmthw", xn, w1)
           + params["conv1_b"][None, :, None, None, None])

    wdw = params["convdw_w"].reshape(Cm, 3)
    midp = jnp.pad(mid, ((0, 0), (0, 0), (1, 1), (0, 0), (0, 0)))
    dw = sum(midp[:, :, k:k + T] * wdw[None, :, k, None, None, None] for k in range(3))
    dw = dw + params["convdw_b"][None, :, None, None, None]

    w3 = params["conv3_w"].reshape(C, Cm)
    out = (jnp.einsum("nmthw,dm->ndthw", dw, w3)
           + params["conv3_b"][None, :, None, None, None])
    return out


def init_params(key, d_model, dw_reduction=1.5, pos_kernel_size=3):
    re_d = int(d_model // dw_reduction)
    ks = jax.random.split(key, 9)
    p = {
        "bn_gamma": jax.random.normal(ks[0], (d_model,), jnp.float32) * 0.1 + 1.0,
        "bn_beta": jax.random.normal(ks[1], (d_model,), jnp.float32) * 0.1,
        "bn_mean": jax.random.normal(ks[2], (d_model,), jnp.float32) * 0.1,
        "bn_var": jax.random.uniform(ks[3], (d_model,), jnp.float32, 0.5, 1.5),
        "conv1_w": jax.random.normal(ks[4], (re_d, d_model, 1, 1, 1), jnp.float32) * 0.2,
        "conv1_b": jax.random.normal(ks[5], (re_d,), jnp.float32) * 0.1,
        "convdw_w": jax.random.normal(ks[6], (re_d, 1, pos_kernel_size, 1, 1), jnp.float32) * 0.2,
        "convdw_b": jax.random.normal(ks[7], (re_d,), jnp.float32) * 0.1,
        # NOTE: original module zero-inits this conv; non-zero values here so the kernel
        # is actually exercised.
        "conv3_w": jax.random.normal(ks[8], (d_model, re_d, 1, 1, 1), jnp.float32) * 0.2,
        "conv3_b": jnp.linspace(-0.1, 0.1, d_model, dtype=jnp.float32),
    }
    return p


if __name__ == "__main__":
    d_model = 6            # -> re_d_model = int(6 // 1.5) = 4 (both padded to 128 in-wrapper)
    N, T, H, W = 2, 4, 8, 8

    key = jax.random.PRNGKey(0)
    kx, kp = jax.random.split(key)
    x = jax.random.normal(kx, (N, d_model, T, H, W), jnp.float32)
    params = init_params(kp, d_model)

    ref = reference_forward(x, params)

    # f32-operand path: tolerance sized so it passes regardless of the MXU's f32
    # matmul pass count (values here are O(1), contraction dims are tiny).
    out_f32 = jax.block_until_ready(
        my_temp_module_forward(x, params, matmul_dtype=jnp.float32))
    assert out_f32.shape == ref.shape == (N, d_model, T, H, W)
    assert jnp.allclose(out_f32, ref, atol=2e-2, rtol=2e-2), "f32 kernel mismatch vs reference"

    # Performance-representative bf16-matmul path (f32 accumulation): looser tolerance
    # accounts for bf16 quantization of the matmul operands.
    out_bf16 = jax.block_until_ready(
        my_temp_module_forward(x, params, matmul_dtype=jnp.bfloat16))
    assert out_bf16.shape == ref.shape
    assert jnp.allclose(out_bf16, ref, atol=5e-2, rtol=5e-2), "bf16 kernel mismatch vs reference"

    print("KERNEL_OK")
</pallas_src>

<mosaic_0001>
module attributes {stable_mosaic.version = 11 : i64} {
  func.func @_pos_embed_kernel(%arg0: i32, %arg1: i32, %arg2: memref<1x4x64x128xf32, #tpu.memory_space<vmem>>, %arg3: memref<128x128xf32, #tpu.memory_space<vmem>>, %arg4: memref<1x128xf32, #tpu.memory_space<vmem>>, %arg5: memref<3x128xf32, #tpu.memory_space<vmem>>, %arg6: memref<128x128xf32, #tpu.memory_space<vmem>>, %arg7: memref<1x128xf32, #tpu.memory_space<vmem>>, %arg8: memref<1x4x64x128xf32, #tpu.memory_space<vmem>>) attributes {dimension_semantics = [#tpu.dimension_semantics<parallel>, #tpu.dimension_semantics<parallel>], iteration_bounds = array<i64: 2, 1>, scalar_prefetch = 0 : i64, scratch_operands = 0 : i64, tpu.core_type = #tpu.core_type<tc>, window_params = [{transform_indices = @transform_0, window_bounds = array<i64: 1, 4, 64, 128>}, {pipeline_mode = #tpu.pipeline_mode<synchronous>, transform_indices = @transform_1, window_bounds = array<i64: 128, 128>}, {pipeline_mode = #tpu.pipeline_mode<synchronous>, transform_indices = @transform_2, window_bounds = array<i64: 1, 128>}, {pipeline_mode = #tpu.pipeline_mode<synchronous>, transform_indices = @transform_3, window_bounds = array<i64: 3, 128>}, {pipeline_mode = #tpu.pipeline_mode<synchronous>, transform_indices = @transform_4, window_bounds = array<i64: 128, 128>}, {pipeline_mode = #tpu.pipeline_mode<synchronous>, transform_indices = @transform_5, window_bounds = array<i64: 1, 128>}, {transform_indices = @transform_6, window_bounds = array<i64: 1, 4, 64, 128>}]} {
    %c0 = arith.constant 0 : index
    %c0_0 = arith.constant 0 : index
    %c0_1 = arith.constant 0 : index
    %c0_2 = arith.constant 0 : index
    %0 = vector.load %arg2[%c0, %c0_0, %c0_1, %c0_2] : memref<1x4x64x128xf32, #tpu.memory_space<vmem>>, vector<1x4x64x128xf32>
    %1 = vector.shape_cast %0 : vector<1x4x64x128xf32> to vector<4x64x128xf32>
    %2 = vector.shape_cast %1 : vector<4x64x128xf32> to vector<256x128xf32>
    %c0_3 = arith.constant 0 : index
    %c0_4 = arith.constant 0 : index
    %3 = vector.load %arg3[%c0_3, %c0_4] : memref<128x128xf32, #tpu.memory_space<vmem>>, vector<128x128xf32>
    %cst = arith.constant dense<0.000000e+00> : vector<256x128xf32>
    %4 = tpu.matmul %2, %3, %cst {dimension_numbers = #tpu.dot_dimension_numbers<[1], [0], [0], [1], [0, 0, 1, 1], [], []>} : vector<256x128xf32>, vector<128x128xf32>, vector<256x128xf32> -> vector<256x128xf32>
    %c0_5 = arith.constant 0 : index
    %c0_6 = arith.constant 0 : index
    %5 = vector.load %arg4[%c0_5, %c0_6] : memref<1x128xf32, #tpu.memory_space<vmem>>, vector<1x128xf32>
    %6 = vector.broadcast %5 : vector<1x128xf32> to vector<256x128xf32>
    %7 = arith.addf %4, %6 : vector<256x128xf32>
    %c0_7 = arith.constant 0 : index
    %c0_8 = arith.constant 0 : index
    %8 = vector.load %arg5[%c0_7, %c0_8] : memref<3x128xf32, #tpu.memory_space<vmem>>, vector<3x128xf32>
    %cst_9 = arith.constant 0.000000e+00 : f32
    %9 = vector.broadcast %cst_9 : f32 to vector<64x128xf32>
    %10 = vector.extract_strided_slice %7 {offsets = [0, 0], sizes = [192, 128], strides = [1, 1]} : vector<256x128xf32> to vector<192x128xf32>
    %11 = tpu.concatenate %9, %10 in 0 : vector<64x128xf32>, vector<192x128xf32> -> vector<256x128xf32>
    %12 = vector.extract_strided_slice %7 {offsets = [64, 0], sizes = [192, 128], strides = [1, 1]} : vector<256x128xf32> to vector<192x128xf32>
    %13 = tpu.concatenate %12, %9 in 0 : vector<192x128xf32>, vector<64x128xf32> -> vector<256x128xf32>
    %14 = vector.extract_strided_slice %8 {offsets = [0, 0], sizes = [1, 128], strides = [1, 1]} : vector<3x128xf32> to vector<1x128xf32>
    %15 = vector.broadcast %14 : vector<1x128xf32> to vector<256x128xf32>
    %16 = arith.mulf %11, %15 : vector<256x128xf32>
    %17 = vector.extract_strided_slice %8 {offsets = [1, 0], sizes = [1, 128], strides = [1, 1]} : vector<3x128xf32> to vector<1x128xf32>
    %18 = vector.broadcast %17 : vector<1x128xf32> to vector<256x128xf32>
    %19 = arith.mulf %7, %18 : vector<256x128xf32>
    %20 = arith.addf %16, %19 : vector<256x128xf32>
    %21 = vector.extract_strided_slice %8 {offsets = [2, 0], sizes = [1, 128], strides = [1, 1]} : vector<3x128xf32> to vector<1x128xf32>
    %22 = vector.broadcast %21 : vector<1x128xf32> to vector<256x128xf32>
    %23 = arith.mulf %13, %22 : vector<256x128xf32>
    %24 = arith.addf %20, %23 : vector<256x128xf32>
    %c0_10 = arith.constant 0 : index
    %c0_11 = arith.constant 0 : index
    %25 = vector.load %arg6[%c0_10, %c0_11] : memref<128x128xf32, #tpu.memory_space<vmem>>, vector<128x128xf32>
    %cst_12 = arith.constant dense<0.000000e+00> : vector<256x128xf32>
    %26 = tpu.matmul %24, %25, %cst_12 {dimension_numbers = #tpu.dot_dimension_numbers<[1], [0], [0], [1], [0, 0, 1, 1], [], []>} : vector<256x128xf32>, vector<128x128xf32>, vector<256x128xf32> -> vector<256x128xf32>
    %c0_13 = arith.constant 0 : index
    %c0_14 = arith.constant 0 : index
    %27 = vector.load %arg7[%c0_13, %c0_14] : memref<1x128xf32, #tpu.memory_space<vmem>>, vector<1x128xf32>
    %28 = vector.broadcast %27 : vector<1x128xf32> to vector<256x128xf32>
    %29 = arith.addf %26, %28 : vector<256x128xf32>
    %30 = vector.shape_cast %29 : vector<256x128xf32> to vector<4x64x128xf32>
    %c0_15 = arith.constant 0 : index
    %c0_16 = arith.constant 0 : index
    %c0_17 = arith.constant 0 : index
    %c0_18 = arith.constant 0 : index
    %31 = vector.load %arg8[%c0_15, %c0_16, %c0_17, %c0_18] : memref<1x4x64x128xf32, #tpu.memory_space<vmem>>, vector<1x4x64x128xf32>
    %32 = vector.shape_cast %31 : vector<1x4x64x128xf32> to vector<4x64x128xf32>
    %33 = vector.shape_cast %30 : vector<4x64x128xf32> to vector<1x4x64x128xf32>
    tpu.vector_store %arg8[%c0_15, %c0_16, %c0_17, %c0_18], %33 {strides = array<i32>} : memref<1x4x64x128xf32, #tpu.memory_space<vmem>>, vector<1x4x64x128xf32>,
    return
  }
  func.func @transform_0(%arg0: i32, %arg1: i32) -> (i32, i32, i32, i32) {
    %c0_i32 = arith.constant 0 : i32
    %c0_i32_0 = arith.constant 0 : i32
    %c0_i32_1 = arith.constant 0 : i32
    return %arg0, %c0_i32, %arg1, %c0_i32_0 : i32, i32, i32, i32
  }
  func.func @transform_1(%arg0: i32, %arg1: i32) -> (i32, i32) {
    %c0_i32 = arith.constant 0 : i32
    %c0_i32_0 = arith.constant 0 : i32
    %c0_i32_1 = arith.constant 0 : i32
    return %c0_i32, %c0_i32_0 : i32, i32
  }
  func.func @transform_2(%arg0: i32, %arg1: i32) -> (i32, i32) {
    %c0_i32 = arith.constant 0 : i32
    %c0_i32_0 = arith.constant 0 : i32
    %c0_i32_1 = arith.constant 0 : i32
    return %c0_i32, %c0_i32_0 : i32, i32
  }
  func.func @transform_3(%arg0: i32, %arg1: i32) -> (i32, i32) {
    %c0_i32 = arith.constant 0 : i32
    %c0_i32_0 = arith.constant 0 : i32
    %c0_i32_1 = arith.constant 0 : i32
    return %c0_i32, %c0_i32_0 : i32, i32
  }
  func.func @transform_4(%arg0: i32, %arg1: i32) -> (i32, i32) {
    %c0_i32 = arith.constant 0 : i32
    %c0_i32_0 = arith.constant 0 : i32
    %c0_i32_1 = arith.constant 0 : i32
    return %c0_i32, %c0_i32_0 : i32, i32
  }
  func.func @transform_5(%arg0: i32, %arg1: i32) -> (i32, i32) {
    %c0_i32 = arith.constant 0 : i32
    %c0_i32_0 = arith.constant 0 : i32
    %c0_i32_1 = arith.constant 0 : i32
    return %c0_i32, %c0_i32_0 : i32, i32
  }
  func.func @transform_6(%arg0: i32, %arg1: i32) -> (i32, i32, i32, i32) {
    %c0_i32 = arith.constant 0 : i32
    %c0_i32_0 = arith.constant 0 : i32
    %c0_i32_1 = arith.constant 0 : i32
    return %arg0, %c0_i32, %arg1, %c0_i32_0 : i32, i32, i32, i32
  }
}

</mosaic_0001>

<bundles_post_ra>
// kernel: tpu_custom_call.1
= control target key start
LH: loop header
LB: loop body
LE: loop exit
PB: predicated region body
PF: predicated region fallthrough
CT: control target
= control target key end

     0   :  { %11 = vsyncpa [#allocation3], 0  ;;  %s2441_s0 = inlined_call_operand.hbm [shape: f32[2,4,64,128], index: 0, kind: input, shape index: {}]   ;;  %s2442_s1 = inlined_call_operand.hbm [shape: f32[128,128], index: 1, kind: input, shape index: {}]   ;;  %s2443_s2 = inlined_call_operand.vmem [shape: f32[1,128], index: 2, kind: input, shape index: {}]   ;;  %s2444_s3 = inlined_call_operand.vmem [shape: f32[3,128], index: 3, kind: input, shape index: {}]   ;;  %s2445_s4 = inlined_call_operand.hbm [shape: f32[128,128], index: 4, kind: input, shape index: {}]   ;;  %s2446_s5 = inlined_call_operand.vmem [shape: f32[1,128], index: 5, kind: input, shape index: {}]   ;;  %s2447_s6 = inlined_call_operand.hbm [shape: f32[2,4,64,128], index: 6, kind: output, shape index: {}]  }
   0x1   :  { %13 = vsyncpa [#allocation3 + $0x1], 0 }
   0x2   :  { %14 = vsyncpa [#allocation6], 0 }
   0x3   :  { %15 = vsyncpa [#allocation4], 0 }
   0x4   :  { %17 = vsyncpa [#allocation4 + $0x1], 0  ;;  %s1807_s21 = smov 0   ;;  %s1809_s22 = smov 0  }
   0x5   :  { %s1811_s23 = smov 0   ;;  %s1813_s24 = smov 0  }
   0x6   :  { %s1815_s25 = smov 0   ;;  %s1817_s26 = smov 0  }
   0x7 LB: > { %s1160_s27 = sadd.s32 4294967295, %s1762_s26   ;;  %s1161_s28 = sadd.s32 4294967294, %s1762_s26   ;;  %s1762_s26 = sphi %s1817_s26, %s23_s26   ;;  %s1758_s25 = sphi %s1815_s25, %s2474_s25   ;;  %s1754_s24 = sphi %s1813_s24, %s2473_s24   ;;  %s1750_s23 = sphi %s1811_s23, %s2472_s23   ;;  %s1746_s22 = sphi %s1809_s22, %s2471_s22   ;;  %s1742_s21 = sphi %s1807_s21, %s2470_s21  }
   0x8   : > { %p57_p0 = scmp.ne.s32.totalorder %s1746_s22, %s1742_s21  ;;  %p1841_p1 = scmp.eq.s32.totalorder %s1160_s27, 0 }
   0x9   : > { %p1845_p2 = scmp.eq.s32.totalorder %s1160_s27, 1  ;;  %p194_p3 = scmp.eq.s32.totalorder %s1161_s28, 1 }
   0xa   : > { %s2454_s29 = scalar_select %p1841_p1, 1, 0 }
   0xb   : > { %p1851_p4 = por %p1841_p1, %p57_p0  ;;  %p1162_p5 = scmp.ge.s32.totalorder %s1762_s26, 1 }
   0xc   : > { %p1856_p6 = por %p194_p3, %p57_p0  ;;  %p201_p7 = scmp.lt.s32.totalorder %s1762_s26, 3 }
   0xd   : > { %s2456_s7 = scalar_select %p1851_p4, 1, 0 }
   0xe   : > { %s2457_s8 = scalar_select %p1856_p6, 1, 0 }
   0xf   : > { %p1861_p8 = pnand %p1162_p5, %p201_p7  ;;  %s1764_s10 = smov [#allocation5]  }
  0x10   : > { %2458 = sst [smem:[#allocation12_spill]] %s2457_s8  ;;  %s213_s11 = sshll.u32 %s1764_s10, 4  ;;  %s1865_s11 = int_to_ptr.vmem [resolvable:$true] %s213_s11 }
  0x11   : > { %p1515_p9 = pneg %p1861_p8  ;;  %s1765_s13 = smov [#allocation7]  }
  0x12   : > { %s232_s14 = sshll.u32 %s1765_s13, 4  ;;  %s1590_s17 = scalar_lea.hbm %s2442_s1, 2048  ;;  %s1876_s14 = int_to_ptr.vmem [resolvable:$true] %s232_s14 }
  0x13   : > { %p1872_p11 = pnand %p1515_p9, %p1841_p1  ;;  %p1591_p12 = scmp.ne.s32.totalorder %s2442_s1, %s1590_s17 }
  0x14   : > { %p1597_p5 = scmp.lt.u32.totalorder %s1590_s17, %s2442_s1 }
  0x15   : > { %p1592_p13 = pneg %p1872_p11 }
  0x17   : > { %p1593_p0 = pnand %p1592_p13, %p1591_p12 }
  0x19   : > { %p1594_p3 = pneg %p1593_p0 }
  0x1b   : > { %p1599_p7 = pnand %p1597_p5, %p1594_p3 }
  0x1d   : > { %1602 = shalt.err (!%p1599_p7)
}
  0x1e   : > { %s1603_s28 = scalar_lea.vmem %s1865_s11, 2048  ;;  %p1611_p1 = scmp.lt.s32.totalorder %s1865_s11, %s1865_s11 }
  0x1f   : > { %p1604_p9 = scmp.ne.s32.totalorder %s1865_s11, %s1603_s28  ;;  %p1612_p12 = scmp.lt.s32.totalorder %s1603_s28, %s1603_s28 }
  0x21   : > { %p1606_p10 = pnand %p1604_p9, %p1592_p13  ;;  %p1613_p0 = por %p1612_p12, %p1611_p1 }
  0x23   : > { %p1607_p6 = pneg %p1606_p10 }
  0x25   : > { %p1614_p4 = pnand %p1613_p0, %p1607_p6 }
  0x27   : > { %1617 = shalt.err (!%p1614_p4)
}
  0x28   : > { %s2452_s10 = smov 128   ;;  %s1767_s13 = smov 8  }
  0x29   : > { %1518 = dma.hbm_to_vmem [thread:$0]  (!%p1872_p11), %s2442_s1, 2048, %s1865_s11, [#allocation6], %s2452_s10, %s2452_s10, %s1767_s13  }
  0x2a   : > { %s1618_s19 = scalar_lea.hbm %s2445_s4, 2048 }
  0x2b   : > { %p1619_p1 = scmp.ne.s32.totalorder %s2445_s4, %s1618_s19  ;;  %p1625_p10 = scmp.lt.u32.totalorder %s1618_s19, %s2445_s4 }
  0x2d   : > { %p1621_p4 = pnand %p1619_p1, %p1592_p13 }
  0x2f   : > { %p1622_p6 = pneg %p1621_p4 }
  0x31   : > { %p1627_p3 = pnand %p1625_p10, %p1622_p6 }
  0x33   : > { %1630 = shalt.err (!%p1627_p3)
}
  0x34   : > { %s1631_s11 = scalar_lea.vmem %s1876_s14, 2048  ;;  %p1639_p12 = scmp.lt.s32.totalorder %s1876_s14, %s1876_s14 }
  0x35   : > { %p1632_p5 = scmp.ne.s32.totalorder %s1876_s14, %s1631_s11  ;;  %p1640_p0 = scmp.lt.s32.totalorder %s1631_s11, %s1631_s11 }
  0x37   : > { %p1634_p7 = pnand %p1632_p5, %p1592_p13  ;;  %p1641_p1 = por %p1640_p0, %p1639_p12 }
  0x39   : > { %p1635_p9 = pneg %p1634_p7 }
  0x3b   : > { %p1642_p4 = pnand %p1641_p1, %p1635_p9 }
  0x3d   : > { %1645 = shalt.err (!%p1642_p4)
}
  0x3e   : > { %1521 = dma.hbm_to_vmem [thread:$0]  (!%p1872_p11), %s2445_s4, 2048, %s1876_s14, [#allocation6], %s2452_s10, %s2452_s10, %s1767_s13  }
  0x3f   : > { %s35_s12 = sadd.s32 1, %s1758_s25  ;;  %s44_s16 = sadd.s32 1, %s1750_s23 }
  0x40   : > { %p37_p13 = scmp.ge.s32.totalorder %s35_s12, 2  ;;  %p51_p6 = scmp.ne.s32.totalorder %s1750_s23, %s1746_s22 }
  0x41   : > { %p52_p10 = scmp.eq.s32.totalorder %s1762_s26, 0  ;;  %p1532_p3 = scmp.lt.s32.totalorder %s1762_s26, 2 }
  0x42   : > { %s2476_s12 = smov (%p37_p13, %s35_s12), 0  ;;  %p1946_p7 = por %p1845_p2, %p51_p6 }
  0x43   : > { %p53_p5 = por %p52_p10, %p51_p6  ;;  %s39_s18 = ssub.s32 %s1758_s25, %s2476_s12 }
  0x44   : > { %s2461_s17 = scalar_select %p1946_p7, 1, 0 }
  0x45   : > { %s249_s19 = sand.u32 1, %s1750_s23   ;;  %p42_p9 = scmp.eq.s32.totalorder %s39_s18, 0 }
  0x46   : > { %s1166_s14 = sshll.u32 %s249_s19, 8  ;;  %s1181_s20 = sshll.u32 %s1758_s25, 12 }
  0x47   : > { %s1955_s27 = scalar_select %p42_p9, %s1750_s23, %s44_s16  }
  0x48   : > { %s1960_s8 = scalar_lea.hbm %s2441_s0, %s1181_s20  ;;  %s253_s30 = scalar_lea.vmem [#allocation2], %s1166_s14 }
  0x49   : > { %s262_s15 = sshll.u32 %s253_s30, 4  ;;  %p1964_p2 = pnand %p1532_p3, %p53_p5  ;;  %s1968_s15 = int_to_ptr.vmem [resolvable:$true] %s262_s15 }
  0x4a   : > { %s1970_s16 = scalar_lea.sflag [#allocation3], %s249_s19  ;;  %s1646_s18 = scalar_lea.hbm %s1960_s8, 4096 }
  0x4b   : > { %p1647_p11 = scmp.ne.s32.totalorder %s1960_s8, %s1646_s18  ;;  %p1648_p12 = pneg %p1964_p2 }
  0x4c   : > { %s1651_s28 = scalar_lea.hbm %s2441_s0, 8192  ;;  %p1652_p4 = scmp.lt.u32.totalorder %s1960_s8, %s2441_s0 }
  0x4d   : > { %p1649_p0 = pnand %p1648_p12, %p1647_p11  ;;  %p1653_p13 = scmp.lt.u32.totalorder %s1651_s28, %s1646_s18 }
  0x4e   : > { %p1655_p10 = scmp.lt.u32.totalorder %s1646_s18, %s1960_s8 }
  0x4f   : > { %p1650_p1 = pneg %p1649_p0  ;;  %p1654_p6 = por %p1653_p13, %p1652_p4 }
  0x51   : > { %p1656_p3 = por %p1655_p10, %p1654_p6 }
  0x53   : > { %p1657_p5 = pnand %p1656_p3, %p1650_p1 }
  0x55   : > { %1660 = shalt.err (!%p1657_p5)
}
  0x56   : > { %s1661_s19 = scalar_lea.vmem %s1968_s15, 4096  ;;  %s1768_s14 = smov [#allocation2]  }
  0x57   : > { %p1662_p9 = scmp.ne.s32.totalorder %s1968_s15, %s1661_s19  ;;  %s1666_s20 = sshll.u32 %s1768_s14, 4  ;;  %s1667_s20 = int_to_ptr.vmem [resolvable:$false] %s1666_s20 }
  0x58   : > { %s1668_s11 = scalar_lea.vmem %s1667_s20, 8192  ;;  %p1669_p7 = scmp.lt.s32.totalorder %s1968_s15, %s1667_s20 }
  0x59   : > { %p1664_p11 = pnand %p1662_p9, %p1648_p12  ;;  %p1670_p4 = scmp.lt.s32.totalorder %s1668_s11, %s1661_s19 }
  0x5b   : > { %p1665_p0 = pneg %p1664_p11  ;;  %p1671_p13 = por %p1670_p4, %p1669_p7 }
  0x5d   : > { %p1672_p6 = pnand %p1671_p13, %p1665_p0 }
  0x5f   : > { %1675 = shalt.err (!%p1672_p6)
}
  0x60   : > { %s2463_s18 = smov 128   ;;  %274 = sbr.rel (%p1861_p8) target bundleno = 668 (0x29c), region = 44 }
  0x61   : > { %1525 = dma.hbm_to_vmem [thread:$0]  (!%p1964_p2), %s1960_s8, 4096, %s1968_s15, %s1970_s16, %s2463_s18, %s2463_s18, %s1767_s13  }
  0x62   : > { %s2004_s28 = sand.u32 (!%p1861_p8), 1, %s1746_s22   ;;  %p2464_p7 = scmp.ne.s32.totalorder (!%p1861_p8), %s2456_s7, 0 }
  0x63   : > { %s1170_s30 = sshll.u32 (!%p1861_p8), %s2004_s28, 8  ;;  %s277_s19 = scalar_lea.sflag (!%p1861_p8), [#allocation3], %s2004_s28 }
  0x64   : > { %s2010_s10 = scalar_lea.vmem (!%p1861_p8), [#allocation2], %s1170_s30 }
  0x67   : > { %1729 = dma.done.wait (%p2464_p7), %s277_s19, 4096  }
  0x68   : > { %1731 = vsyncadd (%p2464_p7), %s277_s19, 4294963200  ;;  %p2465_p2 = scmp.ne.s32.totalorder %s2454_s29, 0 }
  0x6a   : > { %1733 = dma.done.wait (%p2465_p2), [#allocation6], 4096  }
  0x6b   : > { %1735 = vsyncadd (%p2465_p2), [#allocation6], 4294963200  ;;  %v351_v0 = vld [vmem:[#allocation5] sm:$0xff]  ;;  %v352_v1 = vld [vmem:[#allocation5 + $0x8] sm:$0xff]  ;;  %s2321_s16 = scalar_lea.vmem [#allocation8], %s1170_s30  ;;  %s1182_s14 = sshll.u32 %s1754_s24, 12 }
  0x6c   : > { %v353_v2 = vld [vmem:[#allocation5 + $0x10] sm:$0xff]  ;;  %v1439_v3 = vpack.c.bf16 %v352_v1, %v351_v0  ;;  %v354_v4 = vld [vmem:[#allocation5 + $0x18] sm:$0xff]  ;;  %v355_v6 = vld [vmem:[#allocation5 + $0x20] sm:$0xff]  ;;  %s1054_s20 = sshll.u32 %s2321_s16, 4  ;;  %s2387_s30 = scalar_lea.hbm %s2447_s6, %s1182_s14  ;;  %s2389_s20 = int_to_ptr.vmem [resolvable:$true] %s1054_s20 }
  0x6d   : > { %v1443_v5 = vpack.c.bf16 %v354_v4, %v353_v2  ;;  %v356_v7 = vld [vmem:[#allocation5 + $0x28] sm:$0xff]  ;;  %v319_v9 = vld [vmem:[%s2010_s10] sm:$0xff]  ;;  %v357_v10 = vld [vmem:[#allocation5 + $0x30] sm:$0xff]  ;;  %s1039_s24 = scalar_lea.sflag [#allocation4], %s2004_s28  ;;  %s1676_s19 = scalar_lea.vmem %s2389_s20, 4096 }
  0x6e   : > { %1440 = vmatprep.subr.bf16.mxu0 %v1439_v3  ;;  %v1447_v8 = vpack.c.bf16 %v356_v7, %v355_v6  ;;  %v358_v11 = vld [vmem:[#allocation5 + $0x38] sm:$0xff]  ;;  %1311 = vmatprep.mubr.f32.mxu0 %v319_v9  ;;  %v359_v13 = vld [vmem:[#allocation5 + $0x40] sm:$0xff]  ;;  %v360_v14 = vld [vmem:[#allocation5 + $0x48] sm:$0xff]  ;;  %p1677_p8 = scmp.ne.s32.totalorder %s2389_s20, %s1676_s19  ;;  %p2466_p12 = scmp.ne.s32.totalorder %s2461_s17, 0 }
  0x6f   : > { %1442 = vmatpush3.bf16.msra.mxu0 %v1439_v3  ;;  %v1451_v12 = vpack.c.bf16 %v358_v11, %v357_v10  ;;  %v1455_v15 = vpack.c.bf16 %v360_v14, %v359_v13  ;;  %v361_v16 = vld [vmem:[#allocation5 + $0x50] sm:$0xff]  ;;  %v362_v17 = vld [vmem:[#allocation5 + $0x58] sm:$0xff]  ;;  %v758_v18 = vld [vmem:[#allocation7] sm:$0xff] }
  0x70   : > { %1444 = vmatprep.subr.bf16.mxu0 %v1443_v5  ;;  %v759_v19 = vld [vmem:[#allocation7 + $0x8] sm:$0xff]  ;;  %v760_v20 = vld [vmem:[#allocation7 + $0x10] sm:$0xff]  ;;  %v1459_v21 = vpack.c.bf16 %v362_v17, %v361_v16  ;;  %v761_v23 = vld [vmem:[#allocation7 + $0x18] sm:$0xff]  ;;  %v600_v16 = vlaneseq  ;;  %p1678_p1 = pnand %p1677_p8, %p2466_p12 }
  0x71   : > { %v1471_v22 = vpack.c.bf16 %v759_v19, %v758_v18  ;;  %v363_v24 = vld [vmem:[#allocation5 + $0x60] sm:$0xff]  ;;  %v364_v25 = vld [vmem:[#allocation5 + $0x68] sm:$0xff]  ;;  %v1475_v26 = vpack.c.bf16 %v761_v23, %v760_v20  ;;  %v365_v28 = vld [vmem:[#allocation5 + $0x70] sm:$0xff] }
  0x72   : > { %v1463_v27 = vpack.c.bf16 %v364_v25, %v363_v24  ;;  %v366_v29 = vld [vmem:[#allocation5 + $0x78] sm:$0xff]  ;;  %v320_v31 = vld [vmem:[%s2010_s10 + $0x8] sm:$0xff]  ;;  %v321_v32 = vld [vmem:[%s2010_s10 + $0x10] sm:$0xff]  ;;  %v601_v19 = vshrl.u32 %v600_v16, 7  ;;  %p1679_p10 = pneg %p1678_p1 }
  0x73   : > { %1446 = vmatpush3.bf16.msra.mxu0 %v1443_v5  ;;  %1472 = vmatprep.subr.bf16.mxu1 %v1471_v22  ;;  %v1467_v30 = vpack.c.bf16 %v366_v29, %v365_v28  ;;  %v322_v33 = vld [vmem:[%s2010_s10 + $0x18] sm:$0xff]  ;;  %v323_v34 = vld [vmem:[%s2010_s10 + $0x20] sm:$0xff]  ;;  %v324_v35 = vld [vmem:[%s2010_s10 + $0x28] sm:$0xff] }
  0x74   : > { %1448 = vmatprep.subr.bf16.mxu0 %v1447_v8  ;;  %1474 = vmatpush3.bf16.msra.mxu1 %v1471_v22  ;;  %v325_v36 = vld [vmem:[%s2010_s10 + $0x30] sm:$0xff]  ;;  %v326_v37 = vld [vmem:[%s2010_s10 + $0x38] sm:$0xff]  ;;  %v327_v38 = vld [vmem:[%s2010_s10 + $0x40] sm:$0xff]  ;;  %v602_v22 = vsub.s32 0, %v601_v19  ;;  %v631_v23 = vsub.s32 1, %v601_v19 }
  0x75   : > { %1476 = vmatprep.subr.bf16.mxu1 %v1475_v26  ;;  %v328_v39 = vld [vmem:[%s2010_s10 + $0x48] sm:$0xff]  ;;  %v329_v40 = vld [vmem:[%s2010_s10 + $0x50] sm:$0xff]  ;;  %v330_v41 = vld [vmem:[%s2010_s10 + $0x58] sm:$0xff] }
  0x76   : > { %v331_v42 = vld [vmem:[%s2010_s10 + $0x60] sm:$0xff]  ;;  %v332_v43 = vld [vmem:[%s2010_s10 + $0x68] sm:$0xff]  ;;  %v333_v44 = vld [vmem:[%s2010_s10 + $0x70] sm:$0xff] }
  0x77   : > { %1450 = vmatpush3.bf16.msra.mxu0 %v1447_v8  ;;  %v334_v45 = vld [vmem:[%s2010_s10 + $0x78] sm:$0xff]  ;;  %v335_v46 = vld [vmem:[%s2010_s10 + $0x80] sm:$0xff]  ;;  %v336_v47 = vld [vmem:[%s2010_s10 + $0x88] sm:$0xff] }
  0x78   : > { %1452 = vmatprep.subr.bf16.mxu0 %v1451_v12  ;;  %1478 = vmatpush3.bf16.msra.mxu1 %v1475_v26  ;;  %v337_v48 = vld [vmem:[%s2010_s10 + $0x90] sm:$0xff]  ;;  %v338_v49 = vld [vmem:[%s2010_s10 + $0x98] sm:$0xff]  ;;  %v339_v50 = vld [vmem:[%s2010_s10 + $0xa0] sm:$0xff] }
  0x79   : > { %v340_v51 = vld [vmem:[%s2010_s10 + $0xa8] sm:$0xff]  ;;  %v341_v52 = vld [vmem:[%s2010_s10 + $0xb0] sm:$0xff]  ;;  %v342_v53 = vld [vmem:[%s2010_s10 + $0xb8] sm:$0xff] }
  0x7a   : > { %v343_v54 = vld [vmem:[%s2010_s10 + $0xc0] sm:$0xff]  ;;  %v344_v55 = vld [vmem:[%s2010_s10 + $0xc8] sm:$0xff]  ;;  %v345_v56 = vld [vmem:[%s2010_s10 + $0xd0] sm:$0xff] }
  0x7b   : > { %1454 = vmatpush3.bf16.msra.mxu0 %v1451_v12  ;;  %v346_v57 = vld [vmem:[%s2010_s10 + $0xd8] sm:$0xff]  ;;  %v347_v58 = vld [vmem:[%s2010_s10 + $0xe0] sm:$0xff]  ;;  %v348_v59 = vld [vmem:[%s2010_s10 + $0xe8] sm:$0xff] }
  0x7c   : > { %1456 = vmatprep.subr.bf16.mxu0 %v1455_v15  ;;  %v349_v60 = vld [vmem:[%s2010_s10 + $0xf0] sm:$0xff]  ;;  %v350_v61 = vld [vmem:[%s2010_s10 + $0xf8] sm:$0xff]  ;;  %v762_v62 = vld [vmem:[#allocation7 + $0x20] sm:$0xff]  ;;  %s1769_s10 = smov [#allocation8]  }
  0x7d   : > { %v763_v63 = vld [vmem:[#allocation7 + $0x28] sm:$0xff]  ;;  %v764_v1 = vld [vmem:[#allocation7 + $0x30] sm:$0xff]  ;;  %v765_v2 = vld [vmem:[#allocation7 + $0x38] sm:$0xff]  ;;  %s1680_s29 = sshll.u32 %s1769_s10, 4  ;;  %s1681_s29 = int_to_ptr.vmem [resolvable:$false] %s1680_s29 }
  0x7e   : > { %v1479_v0 = vpack.c.bf16 %v763_v63, %v762_v62  ;;  %v1483_v3 = vpack.c.bf16 %v765_v2, %v764_v1  ;;  %v766_v4 = vld [vmem:[#allocation7 + $0x40] sm:$0xff]  ;;  %v767_v5 = vld [vmem:[#allocation7 + $0x48] sm:$0xff]  ;;  %v768_v7 = vld [vmem:[#allocation7 + $0x50] sm:$0xff]  ;;  %s1682_s7 = scalar_lea.vmem %s1681_s29, 8192  ;;  %p1683_p3 = scmp.lt.s32.totalorder %s2389_s20, %s1681_s29 }
  0x7f   : > { %1458 = vmatpush3.bf16.msra.mxu0 %v1455_v15  ;;  %v1487_v6 = vpack.c.bf16 %v767_v5, %v766_v4  ;;  %v769_v8 = vld [vmem:[#allocation7 + $0x58] sm:$0xff]  ;;  %v770_v10 = vld [vmem:[#allocation7 + $0x60] sm:$0xff]  ;;  %v771_v11 = vld [vmem:[#allocation7 + $0x68] sm:$0xff]  ;;  %p1684_p5 = scmp.lt.s32.totalorder %s1682_s7, %s1676_s19 }
  0x80   : > { %1460 = vmatprep.subr.bf16.mxu0 %v1459_v21  ;;  %1480 = vmatprep.subr.bf16.mxu1 %v1479_v0  ;;  %v1491_v9 = vpack.c.bf16 %v769_v8, %v768_v7  ;;  %v1495_v12 = vpack.c.bf16 %v771_v11, %v770_v10  ;;  %v772_v13 = vld [vmem:[#allocation7 + $0x70] sm:$0xff]  ;;  %v773_v14 = vld [vmem:[#allocation7 + $0x78] sm:$0xff]  ;;  %v2055_v24 = vld [vmem:[%s2443_s2] ss:$0 sm:$0xff] }
  0x81   : > { %1482 = vmatpush3.bf16.msra.mxu1 %v1479_v0  ;;  %v1499_v15 = vpack.c.bf16 %v773_v14, %v772_v13  ;;  %v599_v25 = vld [vmem:[%s2444_s3] sm:$0x7]  ;;  %p1685_p9 = por %p1684_p5, %p1683_p3 }
  0x82   : > { %1484 = vmatprep.subr.bf16.mxu1 %v1483_v3  ;;  %v2061_v29 = vrot.slane %v599_v25, %v602_v22 }
  0x83   : > { %1462 = vmatpush3.bf16.msra.mxu0 %v1459_v21  ;;  %p1686_p11 = pnand %p1685_p9, %p1679_p10 }
  0x84   : > { %1464 = vmatprep.subr.bf16.mxu0 %v1463_v27 }
  0x85   : > { %1486 = vmatpush3.bf16.msra.mxu1 %v1483_v3 }
  0x86   : > { %1488 = vmatprep.subr.bf16.mxu1 %v1487_v6 }
  0x87   : > { %1466 = vmatpush3.bf16.msra.mxu0 %v1463_v27 }
  0x88   : > { %1468 = vmatprep.subr.bf16.mxu0 %v1467_v30 }
  0x89   : > { %1490 = vmatpush3.bf16.msra.mxu1 %v1487_v6 }
  0x8a   : > { %1492 = vmatprep.subr.bf16.mxu1 %v1491_v9 }
  0x8b   : > { %1470 = vmatpush3.bf16.msra.mxu0 %v1467_v30  ;;  %v2063_v30 = vrot.slane %v599_v25, %v631_v23 }
  0x8d   : > { %1494 = vmatpush3.bf16.msra.mxu1 %v1491_v9 }
  0x8e   : > { %1312 = vmatmul.mubr.f32.vlgmr.msra.gmra.mrb[0].mxu0 %v320_v31  ;;  %1496 = vmatprep.subr.bf16.mxu1 %v1495_v12 }
  0x8f   : > { %1314 = vmatprep.mubr.f32.mxu0 %v321_v32  ;;  %v699_v32 = vsub.s32 2, %v601_v19 }
  0x91   : > { %1498 = vmatpush3.bf16.msra.mxu1 %v1495_v12 }
  0x92   : > { %1315 = vmatmul.mubr.f32.gmra.mrb[2].mxu0 %v322_v33  ;;  %1500 = vmatprep.subr.bf16.mxu1 %v1499_v15 }
  0x93   : > { %1317 = vmatprep.mubr.f32.mxu0 %v323_v34 }
  0x95   : > { %1502 = vmatpush3.bf16.msra.mxu1 %v1499_v15 }
  0x96   : > { %1318 = vmatmul.mubr.f32.gmra.mrb[4].mxu0 %v324_v35 }
  0x97   : > { %1320 = vmatprep.mubr.f32.mxu0 %v325_v36  ;;  %v2068_v36 = vmul.f32 0.0, %v2061_v29 }
  0x9a   : > { %1321 = vmatmul.mubr.f32.gmra.mrb[6].mxu0 %v326_v37 }
  0x9b   : > { %1323 = vmatprep.mubr.f32.mxu0 %v327_v38 }
  0x9e   : > { %1324 = vmatmul.mubr.f32.gmra.mrb[8].mxu0 %v328_v39 }
  0x9f   : > { %1326 = vmatprep.mubr.f32.mxu0 %v329_v40  ;;  %v2073_v40 = vrot.slane %v599_v25, %v699_v32 }
  0xa2   : > { %1327 = vmatmul.mubr.f32.gmra.mrb[10].mxu0 %v330_v41 }
  0xa3   : > { %1329 = vmatprep.mubr.f32.mxu0 %v331_v42 }
  0xa6   : > { %1330 = vmatmul.mubr.f32.gmra.mrb[12].mxu0 %v332_v43 }
  0xa7   : > { %1332 = vmatprep.mubr.f32.mxu0 %v333_v44 }
  0xaa   : > { %1333 = vmatmul.mubr.f32.gmra.mrb[14].mxu0 %v334_v45 }
  0xab   : > { %1335 = vmatprep.mubr.f32.mxu0 %v335_v46 }
  0xae   : > { %1336 = vmatmul.mubr.f32.gmra.mrb[16].mxu0 %v336_v47 }
  0xaf   : > { %1338 = vmatprep.mubr.f32.mxu0 %v337_v48 }
  0xb2   : > { %1339 = vmatmul.mubr.f32.gmra.mrb[18].mxu0 %v338_v49 }
  0xb3   : > { %1341 = vmatprep.mubr.f32.mxu0 %v339_v50 }
  0xb6   : > { %1342 = vmatmul.mubr.f32.gmra.mrb[20].mxu0 %v340_v51 }
  0xb7   : > { %1344 = vmatprep.mubr.f32.mxu0 %v341_v52 }
  0xba   : > { %1345 = vmatmul.mubr.f32.gmra.mrb[22].mxu0 %v342_v53 }
  0xbb   : > { %1347 = vmatprep.mubr.f32.mxu0 %v343_v54 }
  0xbe   : > { %1348 = vmatmul.mubr.f32.gmra.mrb[24].mxu0 %v344_v55 }
  0xbf   : > { %1350 = vmatprep.mubr.f32.mxu0 %v345_v56 }
  0xc2   : > { %1351 = vmatmul.mubr.f32.gmra.mrb[26].mxu0 %v346_v57 }
  0xc3   : > { %1353 = vmatprep.mubr.f32.mxu0 %v347_v58 }
  0xc6   : > { %1354 = vmatmul.mubr.f32.gmra.mrb[28].mxu0 %v348_v59 }
  0xc7   : > { %1356 = vmatprep.mubr.f32.mxu0 %v349_v60 }
  0xca   : > { %1357 = vmatmul.mubr.f32.gmra.mrb[30].mxu0 %v350_v61 }
 0x161   : > { %v1313_v17 = vpop.f32.mrb[0].mxu0 }
 0x162   : > { %v440_v18 = vpop.f32.mrb[1].mxu0  ;;  %v446_v28 = vadd.f32 %v1313_v17, %v2055_v24 }
 0x163   : > { %v441_v31 = vadd.f32 %v2055_v24, %v440_v18 }
 0x164   : > { %v634_v37 = vmul.f32 %v2063_v30, %v446_v28  ;;  %v606_v42 = vmul.f32 %v2061_v29, %v446_v28 }
 0x165   : > { %v1316_v20 = vpop.f32.mrb[2].mxu0  ;;  %v633_v38 = vmul.f32 %v2063_v30, %v441_v31  ;;  %v605_v43 = vmul.f32 %v2061_v29, %v441_v31 }
 0x166   : > { %v450_v21 = vpop.f32.mrb[3].mxu0  ;;  %v456_v34 = vadd.f32 %v1316_v20, %v2055_v24  ;;  %v666_v47 = vadd.f32 %v634_v37, %v2068_v36 }
 0x167   : > { %v451_v39 = vadd.f32 %v2055_v24, %v450_v21  ;;  %v665_v50 = vadd.f32 %v633_v38, %v2068_v36 }
 0x168   : > { %v636_v44 = vmul.f32 %v2063_v30, %v456_v34  ;;  %v608_v51 = vmul.f32 %v2061_v29, %v456_v34 }
 0x169   : > { %v1319_v26 = vpop.f32.mrb[4].mxu0  ;;  %v635_v48 = vmul.f32 %v2063_v30, %v451_v39  ;;  %v607_v55 = vmul.f32 %v2061_v29, %v451_v39 }
 0x16a   : > { %v460_v27 = vpop.f32.mrb[5].mxu0  ;;  %v466_v52 = vadd.f32 %v1319_v26, %v2055_v24  ;;  %v668_v60 = vadd.f32 %v636_v44, %v2068_v36 }
 0x16b   : > { %v461_v56 = vadd.f32 %v2055_v24, %v460_v27  ;;  %v667_v1 = vadd.f32 %v635_v48, %v2068_v36 }
 0x16c   : > { %v638_v5 = vmul.f32 %v2063_v30, %v466_v52  ;;  %v610_v14 = vmul.f32 %v2061_v29, %v466_v52 }
 0x16d   : > { %v1322_v33 = vpop.f32.mrb[6].mxu0  ;;  %v637_v9 = vmul.f32 %v2063_v30, %v461_v56  ;;  %v609_v19 = vmul.f32 %v2061_v29, %v461_v56 }
 0x16e   : > { %v470_v35 = vpop.f32.mrb[7].mxu0  ;;  %v476_v6 = vadd.f32 %v1322_v33, %v2055_v24  ;;  %v670_v23 = vadd.f32 %v638_v5, %v2068_v36 }
 0x16f   : > { %v471_v10 = vadd.f32 %v2055_v24, %v470_v35  ;;  %v669_v28 = vadd.f32 %v637_v9, %v2068_v36 }
 0x170   : > { %v640_v25 = vmul.f32 %v2063_v30, %v476_v6  ;;  %v612_v44 = vmul.f32 %v2061_v29, %v476_v6 }
 0x171   : > { %v1325_v41 = vpop.f32.mrb[8].mxu0  ;;  %v639_v31 = vmul.f32 %v2063_v30, %v471_v10 }
 0x172   : > { %v2079_v45 = vadd.f32 %v1325_v41, %v2055_v24  ;;  %v480_v46 = vpop.f32.mrb[9].mxu0 }
 0x173   : > { %v2084_v49 = vadd.f32 %v2055_v24, %v480_v46  ;;  %v672_v46 = vadd.f32 %v640_v25, %v2068_v36 }
 0x174   : > { %v642_v53 = vmul.f32 %v2063_v30, %v2079_v45  ;;  %v702_v54 = vmul.f32 %v2073_v40, %v2079_v45 }
 0x175   : > { %v641_v57 = vmul.f32 %v2063_v30, %v2084_v49  ;;  %v1328_v58 = vpop.f32.mrb[10].mxu0  ;;  %v701_v59 = vmul.f32 %v2073_v40, %v2084_v49 }
 0x176   : > { %v2101_v61 = vadd.f32 %v1328_v58, %v2055_v24  ;;  %v490_v62 = vpop.f32.mrb[11].mxu0  ;;  %v727_v63 = vadd.f32 %v702_v54, %v666_v47  ;;  %v2103_v0 = vadd.f32 %v642_v53, %v606_v42 }
 0x177   : > { %v2107_v2 = vadd.f32 %v2055_v24, %v490_v62  ;;  %v726_v3 = vadd.f32 %v701_v59, %v665_v50  ;;  %v2109_v4 = vadd.f32 %v641_v57, %v605_v43  ;;  %v611_v50 = vmul.f32 %v2061_v29, %v471_v10 }
 0x178   : > { %v644_v7 = vmul.f32 %v2063_v30, %v2101_v61  ;;  %v704_v8 = vmul.f32 %v2073_v40, %v2101_v61  ;;  %v614_v62 = vmul.f32 %v2061_v29, %v2079_v45 }
 0x179   : > { %v643_v11 = vmul.f32 %v2063_v30, %v2107_v2  ;;  %v703_v12 = vmul.f32 %v2073_v40, %v2107_v2  ;;  %v1331_v13 = vpop.f32.mrb[12].mxu0  ;;  %1391 = vmatprep.mubr.f32.mxu1 %v726_v3  ;;  %v613_v3 = vmul.f32 %v2061_v29, %v2084_v49 }
 0x17a   : > { %v2125_v15 = vadd.f32 %v1331_v13, %v2055_v24  ;;  %v500_v16 = vpop.f32.mrb[13].mxu0  ;;  %1392 = vmatmul.mubr.f32.vlgmr.msra.gmra.mrb[0].mxu1 %v727_v63  ;;  %v729_v17 = vadd.f32 %v704_v8, %v668_v60  ;;  %v2127_v18 = vadd.f32 %v644_v7, %v608_v51  ;;  %v671_v51 = vadd.f32 %v639_v31, %v2068_v36 }
 0x17b   : > { %v2131_v20 = vadd.f32 %v2055_v24, %v500_v16  ;;  %v728_v21 = vadd.f32 %v703_v12, %v667_v1  ;;  %v2133_v22 = vadd.f32 %v643_v11, %v607_v55  ;;  %v616_v13 = vmul.f32 %v2061_v29, %v2101_v61 }
 0x17c   : > { %v646_v26 = vmul.f32 %v2063_v30, %v2125_v15  ;;  %v706_v27 = vmul.f32 %v2073_v40, %v2125_v15 }
 0x17d   : > { %v645_v32 = vmul.f32 %v2063_v30, %v2131_v20  ;;  %v705_v33 = vmul.f32 %v2073_v40, %v2131_v20  ;;  %v1334_v34 = vpop.f32.mrb[14].mxu0  ;;  %1394 = vmatprep.mubr.f32.mxu1 %v728_v21 }
 0x17e   : > { %v2148_v35 = vadd.f32 %v1334_v34, %v2055_v24  ;;  %v510_v37 = vpop.f32.mrb[15].mxu0  ;;  %1395 = vmatmul.mubr.f32.gmra.mrb[2].mxu1 %v729_v17  ;;  %v731_v38 = vadd.f32 %v706_v27, %v670_v23  ;;  %v2150_v39 = vadd.f32 %v646_v26, %v610_v14 }
 0x17f   : > { %v2153_v41 = vadd.f32 %v2055_v24, %v510_v37  ;;  %v730_v42 = vadd.f32 %v705_v33, %v669_v28  ;;  %v2155_v43 = vadd.f32 %v645_v32, %v609_v19  ;;  %v618_v28 = vmul.f32 %v2061_v29, %v2125_v15 }
 0x180   : > { %v648_v47 = vmul.f32 %v2063_v30, %v2148_v35  ;;  %v708_v48 = vmul.f32 %v2073_v40, %v2148_v35 }
 0x181   : > { %v647_v52 = vmul.f32 %v2063_v30, %v2153_v41  ;;  %v707_v53 = vmul.f32 %v2073_v40, %v2153_v41  ;;  %v1337_v54 = vpop.f32.mrb[16].mxu0  ;;  %1397 = vmatprep.mubr.f32.mxu1 %v730_v42 }
 0x182   : > { %v2170_v55 = vadd.f32 %v1337_v54, %v2055_v24  ;;  %v520_v56 = vpop.f32.mrb[17].mxu0  ;;  %1398 = vmatmul.mubr.f32.gmra.mrb[4].mxu1 %v731_v38  ;;  %v733_v57 = vadd.f32 %v708_v48, %v672_v46  ;;  %v2172_v58 = vadd.f32 %v648_v47, %v612_v44  ;;  %v620_v47 = vmul.f32 %v2061_v29, %v2148_v35 }
 0x183   : > { %v2175_v59 = vadd.f32 %v2055_v24, %v520_v56  ;;  %v732_v36 = vadd.f32 %v707_v53, %v671_v51  ;;  %v2177_v60 = vadd.f32 %v647_v52, %v611_v50 }
 0x184   : > { %v650_v63 = vmul.f32 %v2063_v30, %v2170_v55  ;;  %v710_v1 = vmul.f32 %v2073_v40, %v2170_v55 }
 0x185   : > { %v649_v5 = vmul.f32 %v2063_v30, %v2175_v59  ;;  %v709_v6 = vmul.f32 %v2073_v40, %v2175_v59  ;;  %v1340_v7 = vpop.f32.mrb[18].mxu0  ;;  %1400 = vmatprep.mubr.f32.mxu1 %v732_v36 }
 0x186   : > { %v2192_v8 = vadd.f32 %v1340_v7, %v2055_v24  ;;  %v530_v45 = vpop.f32.mrb[19].mxu0  ;;  %1401 = vmatmul.mubr.f32.gmra.mrb[6].mxu1 %v733_v57  ;;  %v735_v9 = vadd.f32 %v710_v1, %v2103_v0  ;;  %v2195_v10 = vadd.f32 %v650_v63, %v614_v62  ;;  %v615_v0 = vmul.f32 %v2061_v29, %v2107_v2 }
 0x187   : > { %v2198_v11 = vadd.f32 %v2055_v24, %v530_v45  ;;  %v734_v49 = vadd.f32 %v709_v6, %v2109_v4  ;;  %v2201_v12 = vadd.f32 %v649_v5, %v613_v3  ;;  %v622_v62 = vmul.f32 %v2061_v29, %v2170_v55 }
 0x188   : > { %v652_v14 = vmul.f32 %v2063_v30, %v2192_v8  ;;  %v712_v16 = vmul.f32 %v2073_v40, %v2192_v8  ;;  %v621_v3 = vmul.f32 %v2061_v29, %v2175_v59  ;;  %v624_v59 = vmul.f32 %v2061_v29, %v2192_v8 }
 0x189   : > { %v651_v17 = vmul.f32 %v2063_v30, %v2198_v11  ;;  %v711_v4 = vmul.f32 %v2073_v40, %v2198_v11  ;;  %v1343_v19 = vpop.f32.mrb[20].mxu0  ;;  %1403 = vmatprep.mubr.f32.mxu1 %v734_v49 }
 0x18a   : > { %v2216_v21 = vadd.f32 %v1343_v19, %v2055_v24  ;;  %v540_v61 = vpop.f32.mrb[21].mxu0  ;;  %1404 = vmatmul.mubr.f32.gmra.mrb[8].mxu1 %v735_v9  ;;  %v737_v23 = vadd.f32 %v712_v16, %v2127_v18  ;;  %v2219_v25 = vadd.f32 %v652_v14, %v616_v13  ;;  %v617_v18 = vmul.f32 %v2061_v29, %v2131_v20 }
 0x18b   : > { %v2222_v26 = vadd.f32 %v2055_v24, %v540_v61  ;;  %v736_v2 = vadd.f32 %v711_v4, %v2133_v22  ;;  %v2225_v27 = vadd.f32 %v651_v17, %v615_v0  ;;  %v623_v0 = vmul.f32 %v2061_v29, %v2198_v11 }
 0x18c   : > { %v654_v31 = vmul.f32 %v2063_v30, %v2216_v21  ;;  %v714_v32 = vmul.f32 %v2073_v40, %v2216_v21  ;;  %v626_v11 = vmul.f32 %v2061_v29, %v2216_v21 }
 0x18d   : > { %v653_v33 = vmul.f32 %v2063_v30, %v2222_v26  ;;  %v713_v22 = vmul.f32 %v2073_v40, %v2222_v26  ;;  %v1346_v34 = vpop.f32.mrb[22].mxu0  ;;  %1406 = vmatprep.mubr.f32.mxu1 %v736_v2 }
 0x18e   : > { %v2240_v37 = vadd.f32 %v1346_v34, %v2055_v24  ;;  %v550_v15 = vpop.f32.mrb[23].mxu0  ;;  %1407 = vmatmul.mubr.f32.gmra.mrb[10].mxu1 %v737_v23  ;;  %v739_v38 = vadd.f32 %v714_v32, %v2150_v39  ;;  %v2243_v42 = vadd.f32 %v654_v31, %v618_v28  ;;  %v619_v39 = vmul.f32 %v2061_v29, %v2153_v41 }
 0x18f   : > { %v2246_v44 = vadd.f32 %v2055_v24, %v550_v15  ;;  %v738_v20 = vadd.f32 %v713_v22, %v2155_v43  ;;  %v2249_v46 = vadd.f32 %v653_v33, %v617_v18  ;;  %v625_v18 = vmul.f32 %v2061_v29, %v2222_v26 }
 0x190   : > { %v656_v48 = vmul.f32 %v2063_v30, %v2240_v37  ;;  %v716_v50 = vmul.f32 %v2073_v40, %v2240_v37  ;;  %v628_v26 = vmul.f32 %v2061_v29, %v2240_v37 }
 0x191   : > { %v655_v51 = vmul.f32 %v2063_v30, %v2246_v44  ;;  %v715_v43 = vmul.f32 %v2073_v40, %v2246_v44  ;;  %v1349_v52 = vpop.f32.mrb[24].mxu0  ;;  %1409 = vmatprep.mubr.f32.mxu1 %v738_v20 }
 0x192   : > { %v566_v53 = vadd.f32 %v1349_v52, %v2055_v24  ;;  %v560_v35 = vpop.f32.mrb[25].mxu0  ;;  %1410 = vmatmul.mubr.f32.gmra.mrb[12].mxu1 %v739_v38  ;;  %v741_v54 = vadd.f32 %v716_v50, %v2172_v58  ;;  %v688_v56 = vadd.f32 %v656_v48, %v620_v47 }
 0x193   : > { %v561_v57 = vadd.f32 %v2055_v24, %v560_v35  ;;  %v740_v36 = vadd.f32 %v715_v43, %v2177_v60  ;;  %v687_v41 = vadd.f32 %v655_v51, %v619_v39  ;;  %v627_v39 = vmul.f32 %v2061_v29, %v2246_v44 }
 0x194   : > { %v658_v63 = vmul.f32 %v2063_v30, %v566_v53  ;;  %v718_v1 = vmul.f32 %v2073_v40, %v566_v53 }
 0x195   : > { %v657_v5 = vmul.f32 %v2063_v30, %v561_v57  ;;  %v717_v58 = vmul.f32 %v2073_v40, %v561_v57  ;;  %v1352_v6 = vpop.f32.mrb[26].mxu0  ;;  %1412 = vmatprep.mubr.f32.mxu1 %v740_v36  ;;  %v2315_v57 = vld [vmem:[%s2446_s5] ss:$0 sm:$0xff] }
 0x196   : > { %v690_v7 = vadd.f32 %v658_v63, %v622_v62  ;;  %v576_v60 = vadd.f32 %v1352_v6, %v2055_v24  ;;  %v570_v45 = vpop.f32.mrb[27].mxu0  ;;  %1413 = vmatmul.mubr.f32.gmra.mrb[14].mxu1 %v741_v54  ;;  %v743_v55 = vadd.f32 %v718_v1, %v2195_v10 }
 0x197   : > { %v689_v9 = vadd.f32 %v657_v5, %v621_v3  ;;  %v571_v49 = vadd.f32 %v2055_v24, %v570_v45  ;;  %v742_v13 = vadd.f32 %v717_v58, %v2201_v12 }
 0x198   : > { %v660_v14 = vmul.f32 %v2063_v30, %v576_v60  ;;  %v720_v16 = vmul.f32 %v2073_v40, %v576_v60 }
 0x199   : > { %v659_v17 = vmul.f32 %v2063_v30, %v571_v49  ;;  %v719_v4 = vmul.f32 %v2073_v40, %v571_v49  ;;  %v1355_v10 = vpop.f32.mrb[28].mxu0  ;;  %1415 = vmatprep.mubr.f32.mxu1 %v742_v13 }
 0x19a   : > { %v692_v19 = vadd.f32 %v660_v14, %v624_v59  ;;  %v586_v61 = vadd.f32 %v1355_v10, %v2055_v24  ;;  %v580_v12 = vpop.f32.mrb[29].mxu0  ;;  %1416 = vmatmul.mubr.f32.gmra.mrb[16].mxu1 %v743_v55  ;;  %v745_v8 = vadd.f32 %v720_v16, %v2219_v25 }
 0x19b   : > { %v691_v23 = vadd.f32 %v659_v17, %v623_v0  ;;  %v581_v2 = vadd.f32 %v2055_v24, %v580_v12  ;;  %v744_v28 = vadd.f32 %v719_v4, %v2225_v27 }
 0x19c   : > { %v662_v31 = vmul.f32 %v2063_v30, %v586_v61  ;;  %v722_v32 = vmul.f32 %v2073_v40, %v586_v61 }
 0x19d   : > { %v661_v33 = vmul.f32 %v2063_v30, %v581_v2  ;;  %v721_v22 = vmul.f32 %v2073_v40, %v581_v2  ;;  %v1358_v25 = vpop.f32.mrb[30].mxu0  ;;  %1418 = vmatprep.mubr.f32.mxu1 %v744_v28 }
 0x19e   : > { %v694_v34 = vadd.f32 %v662_v31, %v626_v11  ;;  %v596_v15 = vadd.f32 %v1358_v25, %v2055_v24  ;;  %v590_v27 = vpop.f32.mrb[31].mxu0  ;;  %1419 = vmatmul.mubr.f32.gmra.mrb[18].mxu1 %v745_v8  ;;  %v747_v21 = vadd.f32 %v722_v32, %v2243_v42  ;;  %v725_v42 = vmul.f32 0.0, %v2073_v40 }
 0x19f   : > { %v693_v38 = vadd.f32 %v661_v33, %v625_v18  ;;  %v591_v20 = vadd.f32 %v2055_v24, %v590_v27  ;;  %v746_v47 = vadd.f32 %v721_v22, %v2249_v46 }
 0x1a0   : > { %v664_v48 = vmul.f32 %v2063_v30, %v596_v15  ;;  %v724_v50 = vmul.f32 %v2073_v40, %v596_v15  ;;  %v750_v37 = vadd.f32 %v725_v42, %v689_v9  ;;  %v751_v35 = vadd.f32 %v725_v42, %v690_v7 }
 0x1a1   : > { %v663_v51 = vmul.f32 %v2063_v30, %v591_v20  ;;  %v723_v43 = vmul.f32 %v2073_v40, %v591_v20  ;;  %1421 = vmatprep.mubr.f32.mxu1 %v746_v47  ;;  %v752_v54 = vadd.f32 %v725_v42, %v691_v23  ;;  %v753_v29 = vadd.f32 %v725_v42, %v692_v19 }
 0x1a2   : > { %v696_v24 = vadd.f32 %v664_v48, %v628_v26  ;;  %1422 = vmatmul.mubr.f32.gmra.mrb[20].mxu1 %v747_v21  ;;  %v749_v46 = vadd.f32 %v724_v50, %v688_v56  ;;  %v754_v30 = vadd.f32 %v725_v42, %v693_v38  ;;  %v755_v44 = vadd.f32 %v725_v42, %v694_v34 }
 0x1a3   : > { %v695_v52 = vadd.f32 %v663_v51, %v627_v39  ;;  %v748_v53 = vadd.f32 %v723_v43, %v687_v41 }
 0x1a4   : > { %v757_v56 = vadd.f32 %v725_v42, %v696_v24 }
 0x1a5   : > { %1424 = vmatprep.mubr.f32.mxu1 %v748_v53  ;;  %v756_v40 = vadd.f32 %v725_v42, %v695_v52 }
 0x1a6   : > { %1425 = vmatmul.mubr.f32.gmra.mrb[22].mxu1 %v749_v46 }
 0x1a7   : > { %1427 = vmatprep.mubr.f32.mxu1 %v750_v37 }
 0x1aa   : > { %1428 = vmatmul.mubr.f32.gmra.mrb[24].mxu1 %v751_v35 }
 0x1ab   : > { %1430 = vmatprep.mubr.f32.mxu1 %v752_v54 }
 0x1ae   : > { %1431 = vmatmul.mubr.f32.gmra.mrb[26].mxu1 %v753_v29 }
 0x1af   : > { %1433 = vmatprep.mubr.f32.mxu1 %v754_v30 }
 0x1b2   : > { %1434 = vmatmul.mubr.f32.gmra.mrb[28].mxu1 %v755_v44 }
 0x1b3   : > { %1436 = vmatprep.mubr.f32.mxu1 %v756_v40 }
 0x1b6   : > { %1437 = vmatmul.mubr.f32.gmra.mrb[30].mxu1 %v757_v56 }
 0x24d   : > { %v1393_v36 = vpop.f32.mrb[0].mxu1 }
 0x24e   : > { %v853_v41 = vadd.f32 %v1393_v36, %v2315_v57  ;;  %v847_v62 = vpop.f32.mrb[1].mxu1 }
 0x24f   : > { %v848_v63 = vadd.f32 %v2315_v57, %v847_v62 }
 0x250   : > { %1007 = vst [vmem:[%s2321_s16 + $0x8] sm:$0xff] %v853_v41 }
 0x251   : > { %1006 = vst [vmem:[%s2321_s16] sm:$0xff] %v848_v63  ;;  %v1396_v1 = vpop.f32.mrb[2].mxu1 }
 0x252   : > { %v863_v3 = vadd.f32 %v1396_v1, %v2315_v57  ;;  %v857_v5 = vpop.f32.mrb[3].mxu1 }
 0x253   : > { %v858_v58 = vadd.f32 %v2315_v57, %v857_v5 }
 0x254   : > { %1009 = vst [vmem:[%s2321_s16 + $0x18] sm:$0xff] %v863_v3 }
 0x255   : > { %1008 = vst [vmem:[%s2321_s16 + $0x10] sm:$0xff] %v858_v58  ;;  %v1399_v6 = vpop.f32.mrb[4].mxu1 }
 0x256   : > { %v873_v7 = vadd.f32 %v1399_v6, %v2315_v57  ;;  %v867_v60 = vpop.f32.mrb[5].mxu1 }
 0x257   : > { %v868_v45 = vadd.f32 %v2315_v57, %v867_v60 }
 0x258   : > { %1011 = vst [vmem:[%s2321_s16 + $0x28] sm:$0xff] %v873_v7 }
 0x259   : > { %1010 = vst [vmem:[%s2321_s16 + $0x20] sm:$0xff] %v868_v45  ;;  %v1402_v55 = vpop.f32.mrb[6].mxu1 }
 0x25a   : > { %v883_v9 = vadd.f32 %v1402_v55, %v2315_v57  ;;  %v877_v49 = vpop.f32.mrb[7].mxu1 }
 0x25b   : > { %v878_v13 = vadd.f32 %v2315_v57, %v877_v49 }
 0x25c   : > { %1013 = vst [vmem:[%s2321_s16 + $0x38] sm:$0xff] %v883_v9 }
 0x25d   : > { %1012 = vst [vmem:[%s2321_s16 + $0x30] sm:$0xff] %v878_v13  ;;  %v1405_v59 = vpop.f32.mrb[8].mxu1 }
 0x25e   : > { %v893_v14 = vadd.f32 %v1405_v59, %v2315_v57  ;;  %v887_v16 = vpop.f32.mrb[9].mxu1 }
 0x25f   : > { %v888_v0 = vadd.f32 %v2315_v57, %v887_v16 }
 0x260   : > { %1015 = vst [vmem:[%s2321_s16 + $0x48] sm:$0xff] %v893_v14 }
 0x261   : > { %1014 = vst [vmem:[%s2321_s16 + $0x40] sm:$0xff] %v888_v0  ;;  %v1408_v17 = vpop.f32.mrb[10].mxu1 }
 0x262   : > { %v903_v4 = vadd.f32 %v1408_v17, %v2315_v57  ;;  %v897_v10 = vpop.f32.mrb[11].mxu1 }
 0x263   : > { %v898_v19 = vadd.f32 %v2315_v57, %v897_v10 }
 0x264   : > { %1017 = vst [vmem:[%s2321_s16 + $0x58] sm:$0xff] %v903_v4 }
 0x265   : > { %1016 = vst [vmem:[%s2321_s16 + $0x50] sm:$0xff] %v898_v19  ;;  %v1411_v61 = vpop.f32.mrb[12].mxu1 }
 0x266   : > { %v913_v12 = vadd.f32 %v1411_v61, %v2315_v57  ;;  %v907_v8 = vpop.f32.mrb[13].mxu1 }
 0x267   : > { %v908_v23 = vadd.f32 %v2315_v57, %v907_v8 }
 0x268   : > { %1019 = vst [vmem:[%s2321_s16 + $0x68] sm:$0xff] %v913_v12 }
 0x269   : > { %1018 = vst [vmem:[%s2321_s16 + $0x60] sm:$0xff] %v908_v23  ;;  %v1414_v2 = vpop.f32.mrb[14].mxu1 }
 0x26a   : > { %v923_v28 = vadd.f32 %v1414_v2, %v2315_v57  ;;  %v917_v11 = vpop.f32.mrb[15].mxu1 }
 0x26b   : > { %v918_v31 = vadd.f32 %v2315_v57, %v917_v11 }
 0x26c   : > { %1021 = vst [vmem:[%s2321_s16 + $0x78] sm:$0xff] %v923_v28 }
 0x26d   : > { %1020 = vst [vmem:[%s2321_s16 + $0x70] sm:$0xff] %v918_v31  ;;  %v1417_v32 = vpop.f32.mrb[16].mxu1 }
 0x26e   : > { %v933_v18 = vadd.f32 %v1417_v32, %v2315_v57  ;;  %v927_v33 = vpop.f32.mrb[17].mxu1 }
 0x26f   : > { %v928_v22 = vadd.f32 %v2315_v57, %v927_v33 }
 0x270   : > { %1023 = vst [vmem:[%s2321_s16 + $0x88] sm:$0xff] %v933_v18 }
 0x271   : > { %1022 = vst [vmem:[%s2321_s16 + $0x80] sm:$0xff] %v928_v22  ;;  %v1420_v25 = vpop.f32.mrb[18].mxu1 }
 0x272   : > { %v943_v34 = vadd.f32 %v1420_v25, %v2315_v57  ;;  %v937_v15 = vpop.f32.mrb[19].mxu1 }
 0x273   : > { %v938_v27 = vadd.f32 %v2315_v57, %v937_v15 }
 0x274   : > { %1025 = vst [vmem:[%s2321_s16 + $0x98] sm:$0xff] %v943_v34 }
 0x275   : > { %1024 = vst [vmem:[%s2321_s16 + $0x90] sm:$0xff] %v938_v27  ;;  %v1423_v21 = vpop.f32.mrb[20].mxu1 }
 0x276   : > { %v953_v38 = vadd.f32 %v1423_v21, %v2315_v57  ;;  %v947_v20 = vpop.f32.mrb[21].mxu1 }
 0x277   : > { %v948_v47 = vadd.f32 %v2315_v57, %v947_v20 }
 0x278   : > { %1027 = vst [vmem:[%s2321_s16 + $0xa8] sm:$0xff] %v953_v38 }
 0x279   : > { %1026 = vst [vmem:[%s2321_s16 + $0xa0] sm:$0xff] %v948_v47  ;;  %v1426_v26 = vpop.f32.mrb[22].mxu1 }
 0x27a   : > { %v963_v48 = vadd.f32 %v1426_v26, %v2315_v57  ;;  %v957_v50 = vpop.f32.mrb[23].mxu1 }
 0x27b   : > { %v958_v39 = vadd.f32 %v2315_v57, %v957_v50 }
 0x27c   : > { %1029 = vst [vmem:[%s2321_s16 + $0xb8] sm:$0xff] %v963_v48 }
 0x27d   : > { %1028 = vst [vmem:[%s2321_s16 + $0xb0] sm:$0xff] %v958_v39  ;;  %v1429_v51 = vpop.f32.mrb[24].mxu1 }
 0x27e   : > { %v973_v43 = vadd.f32 %v1429_v51, %v2315_v57  ;;  %v967_v42 = vpop.f32.mrb[25].mxu1 }
 0x27f   : > { %v968_v24 = vadd.f32 %v2315_v57, %v967_v42 }
 0x280   : > { %1031 = vst [vmem:[%s2321_s16 + $0xc8] sm:$0xff] %v973_v43 }
 0x281   : > { %1030 = vst [vmem:[%s2321_s16 + $0xc0] sm:$0xff] %v968_v24  ;;  %v1432_v46 = vpop.f32.mrb[26].mxu1 }
 0x282   : > { %v983_v52 = vadd.f32 %v1432_v46, %v2315_v57  ;;  %v977_v53 = vpop.f32.mrb[27].mxu1 }
 0x283   : > { %v978_v37 = vadd.f32 %v2315_v57, %v977_v53 }
 0x284   : > { %1033 = vst [vmem:[%s2321_s16 + $0xd8] sm:$0xff] %v983_v52 }
 0x285   : > { %1032 = vst [vmem:[%s2321_s16 + $0xd0] sm:$0xff] %v978_v37  ;;  %v1435_v35 = vpop.f32.mrb[28].mxu1 }
 0x286   : > { %v993_v54 = vadd.f32 %v1435_v35, %v2315_v57  ;;  %v987_v29 = vpop.f32.mrb[29].mxu1 }
 0x287   : > { %v988_v30 = vadd.f32 %v2315_v57, %v987_v29 }
 0x288   : > { %1035 = vst [vmem:[%s2321_s16 + $0xe8] sm:$0xff] %v993_v54 }
 0x289   : > { %1034 = vst [vmem:[%s2321_s16 + $0xe0] sm:$0xff] %v988_v30  ;;  %v1438_v44 = vpop.f32.mrb[30].mxu1 }
 0x28a   : > { %v1003_v40 = vadd.f32 %v1438_v44, %v2315_v57  ;;  %v997_v56 = vpop.f32.mrb[31].mxu1 }
 0x28b   : > { %v998_v36 = vadd.f32 %v2315_v57, %v997_v56 }
 0x28c   : > { %1037 = vst [vmem:[%s2321_s16 + $0xf8] sm:$0xff] %v1003_v40 }
 0x28d   : > { %1036 = vst [vmem:[%s2321_s16 + $0xf0] sm:$0xff] %v998_v36 }
 0x28e   : > { %1689 = shalt.err (!%p1686_p11)
}
 0x28f   : > { %s1690_s9 = scalar_lea.hbm %s2387_s30, 4096  ;;  %s1694_s15 = scalar_lea.hbm %s2447_s6, 8192 }
 0x290   : > { %p1691_p0 = scmp.ne.s32.totalorder %s2387_s30, %s1690_s9  ;;  %p1695_p6 = scmp.lt.u32.totalorder %s2387_s30, %s2447_s6 }
 0x291   : > { %p1696_p7 = scmp.lt.u32.totalorder %s1694_s15, %s1690_s9  ;;  %p1698_p8 = scmp.lt.u32.totalorder %s1690_s9, %s2387_s30 }
 0x292   : > { %p1692_p4 = pnand %p1691_p0, %p2466_p12 }
 0x293   : > { %p1697_p2 = por %p1696_p7, %p1695_p6 }
 0x294   : > { %p1693_p13 = pneg %p1692_p4 }
 0x295   : > { %p1699_p1 = por %p1698_p8, %p1697_p2 }
 0x297   : > { %p1700_p10 = pnand %p1699_p1, %p1693_p13 }
 0x299   : > { %1703 = shalt.err (!%p1700_p10)
}
 0x29a   : > { %s1770_s11 = smov 128   ;;  %s1771_s18 = smov 8  }
 0x29b   : > { %1513 = dma.vmem_to_hbm [thread:$0]  (%p2466_p12), %s2389_s20, 4096, %s2387_s30, %s1039_s24, %s1770_s11, %s1770_s11, %s1771_s18  }
 0x29c PF: > { %s2467_s19 = sld [smem:[#allocation12_spill]]  ;;  %s1069_s10 = sand.u32 1, %s1742_s21  }
 0x29d   : > { %p2469_p5 = scmp.ge.s32.totalorder %s1762_s26, 2  ;;  %s1070_s29 = scalar_lea.sflag [#allocation4], %s1069_s10 }
 0x2a2   : > { %p2468_p3 = scmp.ne.s32.totalorder %s2467_s19, 0 }
 0x2a4   : > { %p1527_p9 = pnand %p2469_p5, %p2468_p3 }
 0x2a6   : > { %1737 = dma.done.wait (!%p1527_p9), %s1070_s29, 4096  }
 0x2a7   : > { %1739 = vsyncadd (!%p1527_p9), %s1070_s29, 4294963200  ;;  %s23_s26 = sadd.s32 1, %s1762_s26   ;;  %s2470_s21 = smov %s1746_s22 }
 0x2a8   : > { %p20_p11 = scmp.ge.s32.totalorder %s23_s26, 4   ;;  %s2471_s22 = smov %s1750_s23 }
 0x2a9   : > { %s2472_s23 = smov %s1955_s27  ;;  %s2473_s24 = smov %s1758_s25 }
 0x2aa   : > { %s2474_s25 = smov %s2476_s12  ;;  %22 = sbr.rel (!%p20_p11) target bundleno = 7 (0x7), region = 97 }
 0x2b1   :  { %1075 = vsyncpa [#allocation3], 1 }
 0x2b2   :  { %1077 = vsyncpa [#allocation3 + $0x1], 1 }
 0x2b3   :  { %1078 = vsyncpa [#allocation6], 1 }
 0x2b4   :  { %1079 = vsyncpa [#allocation4], 1 }
 0x2b5   :  { %1081 = vsyncpa [#allocation4 + $0x1], 1 }

</bundles_post_ra>
